<compile_context>
chip_gen: v7x
topology: tpu7x:2x2x1
jax: 0.10.0
libtpu: 0.0.40
codegen_flags: <defaults>
</compile_context>

<pallas_src>
import jax
import jax.numpy as jnp
from jax import lax
from jax.experimental import pallas as pl
from jax.experimental.pallas import tpu as pltpu

_LANE = 128
_TARGET_BLOCK_ELEMS = 512 * 1024   # ~1 MiB bf16 / 2 MiB f32 per stream per buffer
_MAX_COL_BLOCK = 32 * 1024         # multiple of 128


def _round_up(x, m):
    return -(-x // m) * m


# ----------------------------- kernels ------------------------------------ #

def _make_abs_slab_kernel(pcol, p_total, needs_mask):
    """Kernel producing per-row (= per (b,c,t) slab) sums of |v - r|.

    Grid is (row_tiles, col_tiles); the output block (rows, 128) is resident
    across the col axis and holds the accumulated row sums broadcast across
    lanes (tiny output, collapsed host-side).
    """
    def kernel(v_ref, r_ref, out_ref):
        j = pl.program_id(1)

        @pl.when(j == 0)
        def _():
            out_ref[...] = jnp.zeros_like(out_ref)

        d = jnp.abs(v_ref[...].astype(jnp.float32) - r_ref[...].astype(jnp.float32))
        if needs_mask:
            col = j * pcol + lax.broadcasted_iota(jnp.int32, d.shape, 1)
            d = jnp.where(col < p_total, d, 0.0)
        s = jnp.sum(d, axis=1, keepdims=True)                 # (rows, 1)
        out_ref[...] += jnp.broadcast_to(s, out_ref.shape)    # (rows, 128)

    return kernel


def _kl_sum_kernel(mu_ref, lv_ref, out_ref):
    """Elementwise KL terms accumulated into a resident (rows, 128) block."""
    @pl.when(pl.program_id(0) == 0)
    def _():
        out_ref[...] = jnp.zeros_like(out_ref)

    mu = mu_ref[...].astype(jnp.float32)
    lv = jnp.clip(lv_ref[...].astype(jnp.float32), -30.0, 20.0)  # diffusers clamp
    out_ref[...] += 0.5 * (mu * mu + jnp.exp(lv) - 1.0 - lv)


# ----------------------------- wrappers ------------------------------------ #

def _abs_slab_sums(video, recon):
    """Per-(b, c, t) slab sums of |video - recon| -> float32 vector of len B*C*T."""
    b, c, t, h, w = video.shape
    s_rows, p_cols = b * c * t, h * w
    v2 = video.reshape(s_rows, p_cols)   # contiguous merge: no HBM copy
    r2 = recon.reshape(s_rows, p_cols)

    # Column block: full minor dim when it fits (always legal), else 32K lanes.
    if p_cols <= _MAX_COL_BLOCK:
        pcol = p_cols
    else:
        pcol = _MAX_COL_BLOCK
    n_col_blocks = pl.cdiv(p_cols, pcol)
    needs_mask = (n_col_blocks * pcol != p_cols)

    # Row block: big enough to amortize per-step overhead, never exceeding the
    # array extent (sublane-aligned), bounded so VMEM stays a few MiB.
    max_rows = max(8, (_TARGET_BLOCK_ELEMS // pcol) // 8 * 8)
    if s_rows >= 8:
        rows = min(max_rows, (s_rows // 8) * 8)
    else:
        rows = s_rows                      # full dim: always legal
    n_row_blocks = pl.cdiv(s_rows, rows)
    out_rows = n_row_blocks * rows

    out = pl.pallas_call(
        _make_abs_slab_kernel(pcol, p_cols, needs_mask),
        out_shape=jax.ShapeDtypeStruct((out_rows, _LANE), jnp.float32),
        grid=(n_row_blocks, n_col_blocks),
        in_specs=[pl.BlockSpec((rows, pcol), lambda i, j: (i, j)),
                  pl.BlockSpec((rows, pcol), lambda i, j: (i, j))],
        out_specs=pl.BlockSpec((rows, _LANE), lambda i, j: (i, 0)),
        compiler_params=pltpu.CompilerParams(
            dimension_semantics=("parallel", "arbitrary")),
    )(v2, r2)
    # Row sums were broadcast across lanes; any lane holds the value.
    return out[:s_rows, 0]


def _kl_sum(mean, logvar):
    """Total sum of 0.5*(mu^2 + exp(lv) - 1 - lv) over all elements."""
    n = int(mean.size)
    rows = pl.cdiv(n, _LANE)
    krows = min(512, _round_up(rows, 8))
    rows_p = pl.cdiv(rows, krows) * krows
    pad = rows_p * _LANE - n
    # Zero padding contributes exactly 0: 0.5*(0 + exp(0) - 1 - 0) == 0.
    mu2 = jnp.pad(mean.reshape(-1), (0, pad)).reshape(rows_p, _LANE)
    lv2 = jnp.pad(logvar.reshape(-1), (0, pad)).reshape(rows_p, _LANE)

    out = pl.pallas_call(
        _kl_sum_kernel,
        out_shape=jax.ShapeDtypeStruct((krows, _LANE), jnp.float32),
        grid=(rows_p // krows,),
        in_specs=[pl.BlockSpec((krows, _LANE), lambda i: (i, 0)),
                  pl.BlockSpec((krows, _LANE), lambda i: (i, 0))],
        out_specs=pl.BlockSpec((krows, _LANE), lambda i: (0, 0)),
        compiler_params=pltpu.CompilerParams(
            dimension_semantics=("arbitrary",)),
    )(mu2, lv2)
    return jnp.sum(out)


class VAELossPallas:
    """JAX/Pallas port of VAELoss (no_perceptual path)."""

    def __init__(self, logvar_init=0.0, perceptual_loss_weight=0.1,
                 kl_loss_weight=1e-6):
        # nn.Parameter(torch.ones(()) * logvar_init) -> deterministic scalar
        self.logvar = jnp.asarray(logvar_init, jnp.float32)
        self.perceptual_loss_weight = perceptual_loss_weight
        self.kl_loss_weight = kl_loss_weight

    def __call__(self, video, recon_video, posterior_mean, posterior_logvar,
                 nll_weights=None, no_perceptual=True):
        if (self.perceptual_loss_weight is not None
                and self.perceptual_loss_weight > 0.0 and not no_perceptual):
            raise NotImplementedError("LPIPS perceptual loss not ported (see TODO).")

        b, c, t, h, w = video.shape
        bt = b * t
        p = h * w
        n_total = b * c * t * p

        # Heavy reduction in the kernel: per-(b,c,t) sums of |v - r|.
        abs_bct = _abs_slab_sums(video, recon_video).reshape(b, c, t)

        lv = self.logvar
        inv_exp_lv = jnp.exp(-lv)                      # hoisted out of the kernel

        # sum(|v-r|/exp(lv) + lv) == inv_exp_lv * sum|v-r| + lv * N
        nll_loss = (inv_exp_lv * jnp.sum(abs_bct) + lv * n_total) / bt

        if nll_weights is None:
            weighted_nll_loss = nll_loss
        else:
            wgt = jnp.asarray(nll_weights, jnp.float32)
            if wgt.ndim >= 3 and not (wgt.shape[-1] == 1 and wgt.shape[-2] == 1):
                # TODO(synk): fully elementwise nll_weights (varying over h, w)
                # would need the weights streamed through the kernel.
                raise NotImplementedError(
                    "nll_weights varying over spatial dims is not supported")
            if wgt.ndim == 4:
                wgt = wgt[:, :, 0, 0]
            elif wgt.ndim == 3:
                wgt = wgt[:, :, 0]
            w_fc = jnp.broadcast_to(wgt, (bt, c))               # per (frame, chan)
            w_bct = jnp.transpose(w_fc.reshape(b, t, c), (0, 2, 1))   # (b, c, t)
            weighted_nll_loss = (inv_exp_lv * jnp.sum(w_bct * abs_bct)
                                 + lv * p * jnp.sum(w_bct)) / bt

        weighted_kl_loss = jnp.float32(0.0)
        if self.kl_loss_weight is not None and self.kl_loss_weight > 0.0:
            kl = _kl_sum(posterior_mean, posterior_logvar)
            weighted_kl_loss = (kl / posterior_mean.shape[0]) * self.kl_loss_weight

        return nll_loss, weighted_nll_loss, weighted_kl_loss


# ----------------------------- reference ----------------------------------- #

def _reference(video, recon_video, post_mean, post_logvar, logvar,
               nll_weights, kl_loss_weight):
    b, c, t, h, w = video.shape
    v = jnp.transpose(video, (0, 2, 1, 3, 4)).reshape(b * t, c, h, w).astype(jnp.float32)
    r = jnp.transpose(recon_video, (0, 2, 1, 3, 4)).reshape(b * t, c, h, w).astype(jnp.float32)
    recon_loss = jnp.abs(v - r)
    nll = recon_loss / jnp.exp(logvar) + logvar
    if nll_weights is None:
        wnll = nll
    else:
        wnll = jnp.broadcast_to(jnp.asarray(nll_weights, jnp.float32), nll.shape) * nll
    nll_loss = jnp.sum(nll) / (b * t)
    weighted_nll_loss = jnp.sum(wnll) / (b * t)
    lvc = jnp.clip(post_logvar.astype(jnp.float32), -30.0, 20.0)
    kl = 0.5 * jnp.sum(post_mean.astype(jnp.float32) ** 2 + jnp.exp(lvc) - 1.0 - lvc)
    weighted_kl = (kl / post_mean.shape[0]) * kl_loss_weight
    return nll_loss, weighted_nll_loss, weighted_kl


# ------------------------------- main --------------------------------------- #

if __name__ == "__main__":
    key = jax.random.PRNGKey(0)
    k1, k2, k3, k4, k5 = jax.random.split(key, 5)

    B, C, T, H, W = 2, 3, 2, 16, 16          # channels must be in {1, 3}
    LC, LH, LW = 4, H // 8, W // 8           # latent posterior shape

    video = jax.random.normal(k1, (B, C, T, H, W), jnp.float32).astype(jnp.bfloat16)
    recon = jax.random.normal(k2, (B, C, T, H, W), jnp.float32).astype(jnp.bfloat16)
    post_mean = jax.random.normal(k3, (B, LC, T, LH, LW), jnp.float32)
    post_logvar = 0.1 * jax.random.normal(k4, (B, LC, T, LH, LW), jnp.float32)
    nll_weights = jax.random.uniform(k5, (B * T, 1, 1, 1), jnp.float32) + 0.5

    loss_mod = VAELossPallas(logvar_init=0.0, perceptual_loss_weight=0.1,
                             kl_loss_weight=1e-6)

    nll_loss, wnll_loss, wkl_loss = loss_mod(
        video, recon, post_mean, post_logvar,
        nll_weights=nll_weights, no_perceptual=True)
    jax.block_until_ready((nll_loss, wnll_loss, wkl_loss))

    ref = _reference(video, recon, post_mean, post_logvar, loss_mod.logvar,
                     nll_weights, loss_mod.kl_loss_weight)

    assert jnp.allclose(nll_loss, ref[0], rtol=1e-3, atol=1e-3), (nll_loss, ref[0])
    assert jnp.allclose(wnll_loss, ref[1], rtol=1e-3, atol=1e-3), (wnll_loss, ref[1])
    assert jnp.allclose(wkl_loss, ref[2], rtol=1e-3, atol=1e-6), (wkl_loss, ref[2])

    print("KERNEL_OK")
</pallas_src>

<mosaic_0001>
module attributes {stable_mosaic.version = 11 : i64} {
  func.func @kernel(%arg0: i32, %arg1: i32, %arg2: memref<8x256xbf16, #tpu.memory_space<vmem>>, %arg3: memref<8x256xbf16, #tpu.memory_space<vmem>>, %arg4: memref<8x128xf32, #tpu.memory_space<vmem>>) attributes {dimension_semantics = [#tpu.dimension_semantics<parallel>, #tpu.dimension_semantics<arbitrary>], iteration_bounds = array<i64: 2, 1>, scalar_prefetch = 0 : i64, scratch_operands = 0 : i64, tpu.core_type = #tpu.core_type<tc>, window_params = [{transform_indices = @transform_0, window_bounds = array<i64: 8, 256>}, {transform_indices = @transform_1, window_bounds = array<i64: 8, 256>}, {transform_indices = @transform_2, window_bounds = array<i64: 8, 128>}]} {
    %c0_i32 = arith.constant 0 : i32
    %0 = arith.cmpi eq, %arg1, %c0_i32 : i32
    %1 = arith.extui %0 : i1 to i32
    %c0_i32_0 = arith.constant 0 : i32
    %2 = arith.cmpi ne, %1, %c0_i32_0 : i32
    scf.if %2 {
      %cst_8 = arith.constant 0.000000e+00 : f32
      %16 = vector.broadcast %cst_8 : f32 to vector<8x128xf32>
      %c0_9 = arith.constant 0 : index
      %c0_10 = arith.constant 0 : index
      %17 = vector.load %arg4[%c0_9, %c0_10] : memref<8x128xf32, #tpu.memory_space<vmem>>, vector<8x128xf32>
      tpu.vector_store %arg4[%c0_9, %c0_10], %16 {strides = array<i32>} : memref<8x128xf32, #tpu.memory_space<vmem>>, vector<8x128xf32>,
    } else {
    }
    %c0 = arith.constant 0 : index
    %c0_1 = arith.constant 0 : index
    %3 = vector.load %arg2[%c0, %c0_1] : memref<8x256xbf16, #tpu.memory_space<vmem>>, vector<8x256xbf16>
    %4 = arith.extf %3 : vector<8x256xbf16> to vector<8x256xf32>
    %c0_2 = arith.constant 0 : index
    %c0_3 = arith.constant 0 : index
    %5 = vector.load %arg3[%c0_2, %c0_3] : memref<8x256xbf16, #tpu.memory_space<vmem>>, vector<8x256xbf16>
    %6 = arith.extf %5 : vector<8x256xbf16> to vector<8x256xf32>
    %7 = arith.subf %4, %6 : vector<8x256xf32>
    %8 = math.absf %7 : vector<8x256xf32>
    %cst = arith.constant dense<0.000000e+00> : vector<8xf32>
    %9 = vector.multi_reduction <add>, %8, %cst [1] : vector<8x256xf32> to vector<8xf32>
    %10 = vector.shape_cast %9 : vector<8xf32> to vector<8x1xf32>
    %c0_4 = arith.constant 0 : index
    %c0_5 = arith.constant 0 : index
    %11 = vector.load %arg4[%c0_4, %c0_5] : memref<8x128xf32, #tpu.memory_space<vmem>>, vector<8x128xf32>
    %12 = vector.shape_cast %10 : vector<8x1xf32> to vector<8x1xf32>
    %13 = vector.broadcast %12 : vector<8x1xf32> to vector<8x128xf32>
    %14 = arith.addf %11, %13 : vector<8x128xf32>
    %c0_6 = arith.constant 0 : index
    %c0_7 = arith.constant 0 : index
    %15 = vector.load %arg4[%c0_6, %c0_7] : memref<8x128xf32, #tpu.memory_space<vmem>>, vector<8x128xf32>
    tpu.vector_store %arg4[%c0_6, %c0_7], %14 {strides = array<i32>} : memref<8x128xf32, #tpu.memory_space<vmem>>, vector<8x128xf32>,
    return
  }
  func.func @transform_0(%arg0: i32, %arg1: i32) -> (i32, i32) {
    %c0_i32 = arith.constant 0 : i32
    return %arg0, %arg1 : i32, i32
  }
  func.func @transform_1(%arg0: i32, %arg1: i32) -> (i32, i32) {
    %c0_i32 = arith.constant 0 : i32
    return %arg0, %arg1 : i32, i32
  }
  func.func @transform_2(%arg0: i32, %arg1: i32) -> (i32, i32) {
    %c0_i32 = arith.constant 0 : i32
    %c0_i32_0 = arith.constant 0 : i32
    return %arg0, %c0_i32 : i32, i32
  }
}

</mosaic_0001>

<bundles_post_ra>
// kernel: tpu_custom_call.1
= control target key start
LH: loop header
LB: loop body
LE: loop exit
PB: predicated region body
PF: predicated region fallthrough
CT: control target
= control target key end

     0   :  { %7 = vsyncpa [#allocation3], 0  ;;  %s836_s0 = inlined_call_operand.hbm [shape: bf16[12,256], index: 0, kind: input, shape index: {}]   ;;  %s837_s1 = inlined_call_operand.hbm [shape: bf16[12,256], index: 1, kind: input, shape index: {}]   ;;  %s838_s2 = inlined_call_operand.hbm [shape: f32[16,128], index: 2, kind: output, shape index: {}]  }
   0x1   :  { %9 = vsyncpa [#allocation3 + $0x1], 0 }
   0x2   :  { %10 = vsyncpa [#allocation6], 0 }
   0x3   :  { %12 = vsyncpa [#allocation6 + $0x1], 0 }
   0x4   :  { %13 = vsyncpa [#allocation4], 0 }
   0x5   :  { %15 = vsyncpa [#allocation4 + $0x1], 0  ;;  %s616_s9 = smov 0   ;;  %s618_s10 = smov 0  }
   0x6   :  { %s620_s11 = smov 0   ;;  %s622_s12 = smov 0  }
   0x7   :  { %s624_s13 = smov 0   ;;  %s626_s14 = smov 0  }
   0x8 LB: > { %s362_s15 = sadd.s32 4294967295, %s596_s14   ;;  %s363_s16 = sadd.s32 4294967294, %s596_s14   ;;  %s596_s14 = sphi %s626_s14, %s21_s14   ;;  %s592_s13 = sphi %s624_s13, %s858_s13   ;;  %s588_s12 = sphi %s622_s12, %s857_s12   ;;  %s584_s11 = sphi %s620_s11, %s856_s11   ;;  %s580_s10 = sphi %s618_s10, %s855_s10   ;;  %s576_s9 = sphi %s616_s9, %s854_s9  }
   0x9   : > { %s33_s17 = sadd.s32 1, %s592_s13  ;;  %s42_s18 = sadd.s32 1, %s584_s11 }
   0xa   : > { %p35_p0 = scmp.ge.s32.totalorder %s33_s17, 2  ;;  %p49_p1 = scmp.ne.s32.totalorder %s584_s11, %s580_s10 }
   0xb   : > { %p50_p2 = scmp.eq.s32.totalorder %s596_s14, 0  ;;  %p55_p3 = scmp.ne.s32.totalorder %s580_s10, %s576_s9 }
   0xc   : > { %s860_s17 = smov (%p35_p0, %s33_s17), 0  ;;  %p56_p5 = scmp.eq.s32.totalorder %s362_s15, 0 }
   0xd   : > { %p657_p4 = por %p50_p2, %p49_p1  ;;  %s37_s20 = ssub.s32 %s592_s13, %s860_s17 }
   0xe   : > { %p107_p6 = scmp.eq.s32.totalorder %s362_s15, 1  ;;  %p40_p7 = scmp.eq.s32.totalorder %s37_s20, 0 }
   0xf   : > { %p663_p8 = por %p56_p5, %p55_p3  ;;  %p113_p10 = scmp.eq.s32.totalorder %s363_s16, 1 }
  0x10   : > { %p667_p9 = por %p107_p6, %p49_p1  ;;  %p399_p13 = scmp.lt.s32.totalorder %s596_s14, 2 }
  0x11   : > { %s842_s21 = scalar_select %p663_p8, 1, 0 }
  0x12   : > { %s843_s22 = scalar_select %p667_p9, 1, 0 }
  0x13   : > { %s672_s23 = scalar_select %p40_p7, %s584_s11, %s42_s18  }
  0x14   : > { %p674_p11 = por %p113_p10, %p55_p3  ;;  %s681_s25 = sand.u32 1, %s584_s11  }
  0x15   : > { %s366_s26 = sshll.u32 %s681_s25, 3  ;;  %s380_s27 = sshll.u32 %s592_s13, 7 }
  0x16   : > { %s844_s24 = scalar_select %p674_p11, 1, 0 }
  0x17   : > { %s690_s30 = scalar_lea.hbm %s836_s0, %s380_s27  ;;  %s137_s3 = scalar_lea.vmem [#allocation2], %s366_s26 }
  0x18   : > { %s147_s4 = sshll.u32 %s137_s3, 4  ;;  %p698_p0 = pnand %p399_p13, %p657_p4  ;;  %s694_s4 = int_to_ptr.vmem [resolvable:$true] %s147_s4 }
  0x19   : > { %s134_s6 = scalar_lea.sflag [#allocation3], %s681_s25  ;;  %s450_s7 = scalar_lea.hbm %s690_s30, 128 }
  0x1a   : > { %p451_p3 = scmp.ne.s32.totalorder %s690_s30, %s450_s7  ;;  %p452_p5 = pneg %p698_p0 }
  0x1b   : > { %s455_s16 = scalar_lea.hbm %s836_s0, 256  ;;  %p456_p4 = scmp.lt.u32.totalorder %s690_s30, %s836_s0 }
  0x1c   : > { %p453_p6 = pnand %p452_p5, %p451_p3  ;;  %p457_p10 = scmp.lt.u32.totalorder %s455_s16, %s450_s7 }
  0x1d   : > { %p459_p12 = scmp.lt.u32.totalorder %s450_s7, %s690_s30 }
  0x1e   : > { %p454_p7 = pneg %p453_p6  ;;  %p458_p13 = por %p457_p10, %p456_p4 }
  0x20   : > { %p460_p1 = por %p459_p12, %p458_p13 }
  0x22   : > { %p461_p2 = pnand %p460_p1, %p454_p7 }
  0x24   : > { %464 = shalt.err (!%p461_p2)
}
  0x25   : > { %s465_s20 = scalar_lea.vmem %s694_s4, 128  ;;  %s598_s28 = smov [#allocation2]  }
  0x26   : > { %p466_p3 = scmp.ne.s32.totalorder %s694_s4, %s465_s20  ;;  %s470_s29 = sshll.u32 %s598_s28, 4  ;;  %s471_s29 = int_to_ptr.vmem [resolvable:$false] %s470_s29 }
  0x27   : > { %s472_s3 = scalar_lea.vmem %s471_s29, 256  ;;  %p473_p9 = scmp.lt.s32.totalorder %s694_s4, %s471_s29 }
  0x28   : > { %p468_p6 = pnand %p466_p3, %p452_p5  ;;  %p474_p4 = scmp.lt.s32.totalorder %s472_s3, %s465_s20 }
  0x2a   : > { %p469_p11 = pneg %p468_p6  ;;  %p475_p10 = por %p474_p4, %p473_p9 }
  0x2c   : > { %p476_p12 = pnand %p475_p10, %p469_p11 }
  0x2e   : > { %479 = shalt.err (!%p476_p12)
}
  0x2f   : > { %391 = dma.hbm_to_vmem [thread:$0]  (!%p698_p0), %s690_s30, 128, %s694_s4, %s134_s6  }
  0x30   : > { %p846_p1 = scmp.lt.s32.totalorder %s596_s14, 3  ;;  %p847_p2 = scmp.ge.s32.totalorder %s596_s14, 1 }
  0x31   : > { %s743_s16 = scalar_lea.hbm %s837_s1, %s380_s27  ;;  %s158_s18 = scalar_lea.vmem [#allocation5], %s366_s26 }
  0x32   : > { %p734_p7 = pnand %p847_p2, %p846_p1  ;;  %s168_s19 = sshll.u32 %s158_s18, 4  ;;  %s169_s19 = int_to_ptr.vmem [resolvable:$true] %s168_s19 }
  0x33   : > { %s155_s30 = scalar_lea.sflag [#allocation6], %s681_s25  ;;  %s480_s4 = scalar_lea.hbm %s743_s16, 128 }
  0x34   : > { %s848_s7 = scalar_select %p734_p7, 1, 0 }
  0x35   : > { %p481_p9 = scmp.ne.s32.totalorder %s743_s16, %s480_s4  ;;  %s485_s27 = scalar_lea.hbm %s837_s1, 256 }
  0x36   : > { %p486_p3 = scmp.lt.u32.totalorder %s743_s16, %s837_s1  ;;  %p487_p6 = scmp.lt.u32.totalorder %s485_s27, %s480_s4 }
  0x37   : > { %p483_p11 = pnand %p481_p9, %p452_p5  ;;  %p489_p10 = scmp.lt.u32.totalorder %s480_s4, %s743_s16 }
  0x38   : > { %p488_p4 = por %p487_p6, %p486_p3 }
  0x39   : > { %p484_p13 = pneg %p483_p11 }
  0x3a   : > { %p490_p12 = por %p489_p10, %p488_p4 }
  0x3c   : > { %p491_p1 = pnand %p490_p12, %p484_p13 }
  0x3e   : > { %494 = shalt.err (!%p491_p1)
}
  0x3f   : > { %s495_s25 = scalar_lea.vmem %s169_s19, 128  ;;  %s599_s26 = smov [#allocation5]  }
  0x40   : > { %p496_p2 = scmp.ne.s32.totalorder %s169_s19, %s495_s25  ;;  %s500_s3 = sshll.u32 %s599_s26, 4  ;;  %s501_s3 = int_to_ptr.vmem [resolvable:$false] %s500_s3 }
  0x41   : > { %s502_s8 = scalar_lea.vmem %s501_s3, 256  ;;  %p503_p8 = scmp.lt.s32.totalorder %s169_s19, %s501_s3 }
  0x42   : > { %p498_p9 = pnand %p496_p2, %p452_p5  ;;  %p504_p7 = scmp.lt.s32.totalorder %s502_s8, %s495_s25 }
  0x44   : > { %p499_p11 = pneg %p498_p9  ;;  %p505_p3 = por %p504_p7, %p503_p8 }
  0x46   : > { %p506_p6 = pnand %p505_p3, %p499_p11 }
  0x48   : > { %509 = shalt.err (!%p506_p6)
}
  0x49   : > { %394 = dma.hbm_to_vmem [thread:$0]  (!%p698_p0), %s743_s16, 128, %s169_s19, %s155_s30  }
  0x4a   : > { %p849_p13 = scmp.ne.s32.totalorder %s848_s7, 0 }
  0x4b   : > { %s770_s15 = sand.u32 (!%p849_p13), 1, %s580_s10   ;;  %p850_p5 = scmp.ne.s32.totalorder (!%p849_p13), %s842_s21, 0 }
  0x4c   : > { %177 = sbr.rel (%p849_p13) target bundleno = 251 (0xfb), region = 28  ;;  %s373_s18 = sshll.u32 (!%p849_p13), %s770_s15, 3 }
  0x4d   : > { %s180_s4 = scalar_lea.sflag (!%p849_p13), [#allocation3], %s770_s15  ;;  %s183_s6 = scalar_lea.vmem (!%p849_p13), [#allocation2], %s373_s18 }
  0x53   : > { %563 = dma.done.wait (%p850_p5), %s180_s4, 128  }
  0x54   : > { %565 = vsyncadd (%p850_p5), %s180_s4, 4294967168  ;;  %s189_s5 = scalar_lea.sflag [#allocation6], %s770_s15  ;;  %s192_s16 = scalar_lea.vmem [#allocation5], %s373_s18 }
  0x55   : > { %567 = dma.done.wait (%p850_p5), %s189_s5, 128  }
  0x56   : > { %569 = vsyncadd (%p850_p5), %s189_s5, 4294967168  ;;  %v225_v0 = vld [vmem:[%s183_s6] sm:$0xff]  ;;  %v228_v1 = vld [vmem:[%s192_s16] sm:$0xff]  ;;  %s377_s7 = sshll.u32 %s588_s12, 7  ;;  %s217_s19 = scalar_lea.vmem [#allocation7], %s373_s18 }
  0x57   : > { %v226_v2 = vunpack.c.l.bf16 %v225_v0  ;;  %v227_v3 = vunpack.c.h.bf16 %v225_v0  ;;  %v229_v4 = vunpack.c.l.bf16 %v228_v1  ;;  %v230_v5 = vunpack.c.h.bf16 %v228_v1  ;;  %s255_s30 = sshll.u32 %s217_s19, 4  ;;  %s787_s27 = scalar_lea.hbm %s838_s2, %s377_s7  ;;  %s789_s30 = int_to_ptr.vmem [resolvable:$true] %s255_s30 }
  0x58   : > { %s242_s28 = scalar_lea.sflag [#allocation4], %s770_s15  ;;  %s510_s29 = scalar_lea.vmem %s789_s30, 128 }
  0x59   : > { %v231_v6 = vsub.f32 %v226_v2, %v229_v4  ;;  %v232_v7 = vsub.f32 %v227_v3, %v230_v5  ;;  %p511_p8 = scmp.ne.s32.totalorder %s789_s30, %s510_s29  ;;  %p851_p0 = scmp.ne.s32.totalorder %s843_s22, 0 }
  0x5a   : > { %s600_s12 = smov [#allocation7]  }
  0x5b   : > { %v233_v8 = vand.u32 2147483647, %v231_v6  ;;  %v234_v9 = vand.u32 2147483647, %v232_v7  ;;  %p512_p7 = pnand %p511_p8, %p851_p0  ;;  %s514_s25 = sshll.u32 %s600_s12, 4  ;;  %s515_s25 = int_to_ptr.vmem [resolvable:$false] %s514_s25 }
  0x5c   : > { %s516_s26 = scalar_lea.vmem %s515_s25, 256  ;;  %p517_p10 = scmp.lt.s32.totalorder %s789_s30, %s515_s25 }
  0x5d   : > { %v235_v10 = vadd.f32 %v234_v9, %v233_v8  ;;  %p513_p4 = pneg %p512_p7  ;;  %p518_p12 = scmp.lt.s32.totalorder %s516_s26, %s510_s29 }
  0x5f   : > { %236 = vadd.xlane.f32.xlu0 %v235_v10  ;;  %p519_p1 = por %p518_p12, %p517_p10 }
  0x61   : > { %p520_p2 = pnand %p519_p1, %p513_p4 }
  0xec   : > { %v237_v11 = vpop.xlane.xlu0 %236 }
  0xed   : > { %240 = vst [vmem:[%s217_s19] sm:$0xff] %v237_v11 }
  0xee   : > { %523 = shalt.err (!%p520_p2)
}
  0xef   : > { %s524_s3 = scalar_lea.hbm %s787_s27, 128  ;;  %s528_s18 = scalar_lea.hbm %s838_s2, 256 }
  0xf0   : > { %p525_p9 = scmp.ne.s32.totalorder %s787_s27, %s524_s3  ;;  %p529_p6 = scmp.lt.u32.totalorder %s787_s27, %s838_s2 }
  0xf1   : > { %p530_p13 = scmp.lt.u32.totalorder %s528_s18, %s524_s3  ;;  %p532_p8 = scmp.lt.u32.totalorder %s524_s3, %s787_s27 }
  0xf2   : > { %p526_p11 = pnand %p525_p9, %p851_p0 }
  0xf3   : > { %p531_p5 = por %p530_p13, %p529_p6 }
  0xf4   : > { %p527_p3 = pneg %p526_p11 }
  0xf5   : > { %p533_p7 = por %p532_p8, %p531_p5 }
  0xf7   : > { %p534_p4 = pnand %p533_p7, %p527_p3 }
  0xf9   : > { %537 = shalt.err (!%p534_p4)
}
  0xfa   : > { %386 = dma.vmem_to_hbm [thread:$0]  (%p851_p0), %s789_s30, 128, %s787_s27, %s242_s28  }
  0xfb PF: > { %s267_s5 = sand.u32 1, %s576_s9   ;;  %p852_p10 = scmp.ne.s32.totalorder %s844_s24, 0 }
  0xfc   : > { %p853_p12 = scmp.ge.s32.totalorder %s596_s14, 2  ;;  %s268_s16 = scalar_lea.sflag [#allocation4], %s267_s5 }
  0xfe   : > { %p396_p1 = pnand %p853_p12, %p852_p10 }
 0x100   : > { %571 = dma.done.wait (!%p396_p1), %s268_s16, 128  }
 0x101   : > { %573 = vsyncadd (!%p396_p1), %s268_s16, 4294967168  ;;  %s21_s14 = sadd.s32 1, %s596_s14   ;;  %s854_s9 = smov %s580_s10 }
 0x102   : > { %p18_p2 = scmp.ge.s32.totalorder %s21_s14, 4   ;;  %s855_s10 = smov %s584_s11 }
 0x103   : > { %s856_s11 = smov %s672_s23  ;;  %s857_s12 = smov %s592_s13 }
 0x104   : > { %s858_s13 = smov %s860_s17  ;;  %20 = sbr.rel (!%p18_p2) target bundleno = 8 (0x8), region = 90 }
 0x10b   :  { %273 = vsyncpa [#allocation3], 1 }
 0x10c   :  { %275 = vsyncpa [#allocation3 + $0x1], 1 }
 0x10d   :  { %276 = vsyncpa [#allocation6], 1 }
 0x10e   :  { %278 = vsyncpa [#allocation6 + $0x1], 1 }
 0x10f   :  { %279 = vsyncpa [#allocation4], 1 }
 0x110   :  { %281 = vsyncpa [#allocation4 + $0x1], 1 }

</bundles_post_ra>
